<compile_context>
chip_gen: v7x
topology: tpu7x:2x2x1
jax: 0.10.0
libtpu: 0.0.40
codegen_flags: <defaults>
</compile_context>

<pallas_src>
import jax
import jax.numpy as jnp
from jax.experimental import pallas as pl
from jax.experimental.pallas import tpu as pltpu


def _make_kernel(tb, seq_len):
    def kernel(x_ref, w1_ref, b1_ref, wv_ref, o_ref):
        # x_ref:  (TB*S, D)  TB batch elements, flattened into MXU rows
        # w1_ref: (D, D)     linear1 weight, pre-transposed to (in, out)
        # b1_ref: (1, D)     linear1 bias
        # wv_ref: (1, D)     fused Wb @ W2^T, as a lane row
        # o_ref:  (TB, S)    per-batch softmax over the sequence axis
        h = jnp.dot(x_ref[...], w1_ref[...],
                    preferred_element_type=jnp.float32) + b1_ref[...]
        h = h * jax.nn.sigmoid(h)                        # Swish (VPU + EUP)

        # Split rows back to (TB, S, D) (last dim unchanged -> cheap
        # sublane regrouping) and score with a broadcast multiply +
        # cross-lane reduce (XLU), no MXU needed for an N=1 output.
        h3 = h.reshape(tb, seq_len, h.shape[-1])
        scores = jnp.sum(h3 * wv_ref[...], axis=-1)      # (TB, S)

        # Max-stabilised softmax over the sequence axis.
        m = jnp.max(scores, axis=-1, keepdims=True)
        e = jnp.exp(scores - m)
        o_ref[...] = (e / jnp.sum(e, axis=-1, keepdims=True)).astype(o_ref.dtype)

    return kernel


def _pick_batch_tile(B, S, D, itemsize=4, vmem_budget=8 << 20):
    """One grid step if the whole batch fits a conservative (double-buffered)
    VMEM budget; otherwise the largest multiple-of-8 divisor of B that fits.
    TB == B or TB % 8 == 0 keeps the (TB*S, D) / (TB, S) blocks tile-legal."""
    if 2 * B * S * D * itemsize <= vmem_budget:
        return B
    best = None
    for cand in range(8, B + 1, 8):
        if B % cand == 0 and 2 * cand * S * D * itemsize <= vmem_budget:
            best = cand
    return best if best is not None else B


def temporal_attention(x, w1, b1, wb, w2, *, tb=None):
    """x:  (B, S, D) float32
    w1: (D, D) PyTorch-layout linear1 weight (out, in)
    b1: (D,)   linear1 bias
    wb: (D, D) bilinear weight
    w2: (1, D) PyTorch-layout linear2 weight (out, in)
    Returns softmax attention weights of shape (B, S, 1)."""
    B, S, D = x.shape
    if tb is None:
        tb = _pick_batch_tile(B, S, D)
    assert B % tb == 0 and (tb == B or tb % 8 == 0)
    num_blocks = B // tb

    # Wrapper-side (XLA) prep: transpose W1 to (in, out), fuse Wb @ W2^T into
    # one row vector, flatten batch/seq so the kernel sees plain MXU rows.
    w1_t = w1.T.astype(jnp.float32)                                  # (D, D)
    b1_r = b1.reshape(1, D).astype(jnp.float32)                      # (1, D)
    wv_r = (wb @ w2.reshape(D)).reshape(1, D).astype(jnp.float32)    # (1, D)
    x2 = x.reshape(B * S, D).astype(jnp.float32)                     # (B*S, D)

    scores = pl.pallas_call(
        _make_kernel(tb, S),
        out_shape=jax.ShapeDtypeStruct((B, S), jnp.float32),
        grid=(num_blocks,),
        in_specs=[
            pl.BlockSpec((tb * S, D), lambda i: (i, 0)),
            pl.BlockSpec((D, D), lambda i: (0, 0)),
            pl.BlockSpec((1, D), lambda i: (0, 0)),
            pl.BlockSpec((1, D), lambda i: (0, 0)),
        ],
        out_specs=pl.BlockSpec((tb, S), lambda i: (i, 0)),
        compiler_params=pltpu.CompilerParams(
            dimension_semantics=("parallel",)),
    )(x2, w1_t, b1_r, wv_r)

    return scores.reshape(B, S, 1)


def _xavier_uniform(key, shape):
    fan_out, fan_in = shape
    bound = (6.0 / (fan_in + fan_out)) ** 0.5
    return jax.random.uniform(key, shape, jnp.float32, -bound, bound)


def _reference(x, w1, b1, wb, w2):
    h = x @ w1.T + b1
    h = h * jax.nn.sigmoid(h)
    h = h @ wb
    s = h @ w2.T                         # (B, S, 1)
    return jax.nn.softmax(s, axis=1)


if __name__ == "__main__":
    B, S, D = 2, 8, 32

    key = jax.random.PRNGKey(0)
    kx, kw1, kb1, kwb, kw2 = jax.random.split(key, 5)

    x = jax.random.normal(kx, (B, S, D), jnp.float32)

    # Deterministic parameter init matching __init__ shapes (xavier_uniform
    # for weights, small uniform for linear1 bias).
    w1 = _xavier_uniform(kw1, (D, D))            # linear1.weight (out, in)
    b1 = jax.random.uniform(kb1, (D,), jnp.float32,
                            -1.0 / (D ** 0.5), 1.0 / (D ** 0.5))
    wb = _xavier_uniform(kwb, (D, D))            # bilinear_weight
    w2 = _xavier_uniform(kw2, (1, D))            # linear2.weight (out, in)

    out = temporal_attention(x, w1, b1, wb, w2)
    out = jax.block_until_ready(out)

    ref = _reference(x, w1, b1, wb, w2)
    assert out.shape == (B, S, 1)
    assert jnp.allclose(out, ref, atol=1e-5, rtol=1e-5)

    print("KERNEL_OK")
</pallas_src>

<mosaic_0001>
module attributes {stable_mosaic.version = 11 : i64} {
  func.func @kernel(%arg0: i32, %arg1: memref<16x32xf32, #tpu.memory_space<vmem>>, %arg2: memref<32x32xf32, #tpu.memory_space<vmem>>, %arg3: memref<1x32xf32, #tpu.memory_space<vmem>>, %arg4: memref<1x32xf32, #tpu.memory_space<vmem>>, %arg5: memref<2x8xf32, #tpu.memory_space<vmem>>) attributes {dimension_semantics = [#tpu.dimension_semantics<parallel>], iteration_bounds = array<i64: 1>, scalar_prefetch = 0 : i64, scratch_operands = 0 : i64, tpu.core_type = #tpu.core_type<tc>, window_params = [{transform_indices = @transform_0, window_bounds = array<i64: 16, 32>}, {pipeline_mode = #tpu.pipeline_mode<synchronous>, transform_indices = @transform_1, window_bounds = array<i64: 32, 32>}, {pipeline_mode = #tpu.pipeline_mode<synchronous>, transform_indices = @transform_2, window_bounds = array<i64: 1, 32>}, {pipeline_mode = #tpu.pipeline_mode<synchronous>, transform_indices = @transform_3, window_bounds = array<i64: 1, 32>}, {transform_indices = @transform_4, window_bounds = array<i64: 2, 8>}]} {
    %c0 = arith.constant 0 : index
    %c0_0 = arith.constant 0 : index
    %0 = vector.load %arg1[%c0, %c0_0] : memref<16x32xf32, #tpu.memory_space<vmem>>, vector<16x32xf32>
    %c0_1 = arith.constant 0 : index
    %c0_2 = arith.constant 0 : index
    %1 = vector.load %arg2[%c0_1, %c0_2] : memref<32x32xf32, #tpu.memory_space<vmem>>, vector<32x32xf32>
    %cst = arith.constant dense<0.000000e+00> : vector<16x32xf32>
    %2 = tpu.matmul %0, %1, %cst {dimension_numbers = #tpu.dot_dimension_numbers<[1], [0], [0], [1], [0, 0, 1, 1], [], []>} : vector<16x32xf32>, vector<32x32xf32>, vector<16x32xf32> -> vector<16x32xf32>
    %c0_3 = arith.constant 0 : index
    %c0_4 = arith.constant 0 : index
    %3 = vector.load %arg3[%c0_3, %c0_4] : memref<1x32xf32, #tpu.memory_space<vmem>>, vector<1x32xf32>
    %4 = vector.broadcast %3 : vector<1x32xf32> to vector<16x32xf32>
    %5 = arith.addf %2, %4 : vector<16x32xf32>
    %6 = arith.negf %5 : vector<16x32xf32>
    %7 = math.exp %6 : vector<16x32xf32>
    %cst_5 = arith.constant 1.000000e+00 : f32
    %8 = vector.broadcast %cst_5 : f32 to vector<16x32xf32>
    %9 = arith.addf %8, %7 : vector<16x32xf32>
    %10 = arith.divf %8, %9 : vector<16x32xf32>
    %11 = arith.mulf %5, %10 : vector<16x32xf32>
    %12 = vector.shape_cast %11 : vector<16x32xf32> to vector<2x8x32xf32>
    %c0_6 = arith.constant 0 : index
    %c0_7 = arith.constant 0 : index
    %13 = vector.load %arg4[%c0_6, %c0_7] : memref<1x32xf32, #tpu.memory_space<vmem>>, vector<1x32xf32>
    %14 = vector.shape_cast %13 : vector<1x32xf32> to vector<1x1x32xf32>
    %15 = vector.broadcast %14 : vector<1x1x32xf32> to vector<2x8x32xf32>
    %16 = arith.mulf %12, %15 : vector<2x8x32xf32>
    %cst_8 = arith.constant dense<0.000000e+00> : vector<2x8xf32>
    %17 = vector.multi_reduction <add>, %16, %cst_8 [2] : vector<2x8x32xf32> to vector<2x8xf32>
    %cst_9 = arith.constant dense<0xFF800000> : vector<2xf32>
    %18 = vector.multi_reduction <maximumf>, %17, %cst_9 [1] : vector<2x8xf32> to vector<2xf32>
    %19 = vector.shape_cast %18 : vector<2xf32> to vector<2x1xf32>
    %20 = vector.broadcast %19 : vector<2x1xf32> to vector<2x8xf32>
    %21 = arith.subf %17, %20 : vector<2x8xf32>
    %22 = math.exp %21 : vector<2x8xf32>
    %cst_10 = arith.constant dense<0.000000e+00> : vector<2xf32>
    %23 = vector.multi_reduction <add>, %22, %cst_10 [1] : vector<2x8xf32> to vector<2xf32>
    %24 = vector.shape_cast %23 : vector<2xf32> to vector<2x1xf32>
    %25 = vector.broadcast %24 : vector<2x1xf32> to vector<2x8xf32>
    %26 = arith.divf %22, %25 : vector<2x8xf32>
    %c0_11 = arith.constant 0 : index
    %c0_12 = arith.constant 0 : index
    %27 = vector.load %arg5[%c0_11, %c0_12] : memref<2x8xf32, #tpu.memory_space<vmem>>, vector<2x8xf32>
    tpu.vector_store %arg5[%c0_11, %c0_12], %26 {strides = array<i32>} : memref<2x8xf32, #tpu.memory_space<vmem>>, vector<2x8xf32>,
    return
  }
  func.func @transform_0(%arg0: i32) -> (i32, i32) {
    %c0_i32 = arith.constant 0 : i32
    %c0_i32_0 = arith.constant 0 : i32
    return %arg0, %c0_i32 : i32, i32
  }
  func.func @transform_1(%arg0: i32) -> (i32, i32) {
    %c0_i32 = arith.constant 0 : i32
    %c0_i32_0 = arith.constant 0 : i32
    %c0_i32_1 = arith.constant 0 : i32
    return %c0_i32, %c0_i32_0 : i32, i32
  }
  func.func @transform_2(%arg0: i32) -> (i32, i32) {
    %c0_i32 = arith.constant 0 : i32
    %c0_i32_0 = arith.constant 0 : i32
    %c0_i32_1 = arith.constant 0 : i32
    return %c0_i32, %c0_i32_0 : i32, i32
  }
  func.func @transform_3(%arg0: i32) -> (i32, i32) {
    %c0_i32 = arith.constant 0 : i32
    %c0_i32_0 = arith.constant 0 : i32
    %c0_i32_1 = arith.constant 0 : i32
    return %c0_i32, %c0_i32_0 : i32, i32
  }
  func.func @transform_4(%arg0: i32) -> (i32, i32) {
    %c0_i32 = arith.constant 0 : i32
    %c0_i32_0 = arith.constant 0 : i32
    return %arg0, %c0_i32 : i32, i32
  }
}

</mosaic_0001>

<bundles_post_ra>
// kernel: tpu_custom_call.1
= control target key start
LH: loop header
LB: loop body
LE: loop exit
PB: predicated region body
PF: predicated region fallthrough
CT: control target
= control target key end

     0   :  { %9 = vsyncpa [#allocation3], 0  ;;  %s487_s0 = inlined_call_operand.hbm [shape: f32[16,32], index: 0, kind: input, shape index: {}]   ;;  %s488_s1 = inlined_call_operand.hbm [shape: f32[32,32], index: 1, kind: input, shape index: {}]   ;;  %s489_s2 = inlined_call_operand.vmem [shape: f32[1,32], index: 2, kind: input, shape index: {}]   ;;  %s490_s3 = inlined_call_operand.vmem [shape: f32[1,32], index: 3, kind: input, shape index: {}]   ;;  %s491_s4 = inlined_call_operand.hbm [shape: f32[2,8], index: 4, kind: output, shape index: {}]  }
   0x1   :  { %10 = vsyncpa [#allocation6], 0 }
   0x2   :  { %11 = vsyncpa [#allocation4], 0  ;;  %s404_s15 = smov [#allocation2]   ;;  %s332_s19 = scalar_lea.hbm %s487_s0, 256 }
   0x3   :  { %s17_s16 = sshll.u32 %s404_s15, 4  ;;  %p333_p0 = scmp.ne.s32.totalorder %s487_s0, %s332_s19  ;;  %s18_s16 = int_to_ptr.vmem [resolvable:$true] %s17_s16 }
   0x4   :  { %p336_p1 = scmp.lt.u32.totalorder %s332_s19, %s487_s0 }
   0x6   :  { %p338_p2 = pnand %p336_p1, %p333_p0 }
   0x8   :  { %341 = shalt.err (!%p338_p2)
}
   0x9   :  { %s342_s24 = scalar_lea.vmem %s18_s16, 256  ;;  %p347_p4 = scmp.lt.s32.totalorder %s18_s16, %s18_s16 }
   0xa   :  { %p343_p3 = scmp.ne.s32.totalorder %s18_s16, %s342_s24  ;;  %p348_p5 = scmp.lt.s32.totalorder %s342_s24, %s342_s24 }
   0xc   :  { %p349_p6 = por %p348_p5, %p347_p4 }
   0xe   :  { %p350_p7 = pnand %p349_p6, %p343_p3 }
  0x10   :  { %353 = shalt.err (!%p350_p7)
}
  0x11   :  { %s405_s25 = smov 128   ;;  %s406_s26 = smov 8  }
  0x12   :  { %23 = dma.hbm_to_vmem [thread:$0]  %s487_s0, 256, %s18_s16, [#allocation3], %s405_s25, %s405_s25, %s406_s26  }
  0x13   :  { %s407_s29 = smov [#allocation5]   ;;  %s354_s7 = scalar_lea.hbm %s488_s1, 512 }
  0x14   :  { %s29_s30 = sshll.u32 %s407_s29, 4  ;;  %p355_p8 = scmp.ne.s32.totalorder %s488_s1, %s354_s7  ;;  %s30_s30 = int_to_ptr.vmem [resolvable:$true] %s29_s30 }
  0x15   :  { %p358_p9 = scmp.lt.u32.totalorder %s354_s7, %s488_s1 }
  0x17   :  { %p360_p10 = pnand %p358_p9, %p355_p8 }
  0x19   :  { %363 = shalt.err (!%p360_p10)
}
  0x1a   :  { %s364_s12 = scalar_lea.vmem %s30_s30, 512  ;;  %p369_p12 = scmp.lt.s32.totalorder %s30_s30, %s30_s30 }
  0x1b   :  { %p365_p11 = scmp.ne.s32.totalorder %s30_s30, %s364_s12  ;;  %p370_p13 = scmp.lt.s32.totalorder %s364_s12, %s364_s12 }
  0x1d   :  { %p371_p0 = por %p370_p13, %p369_p12 }
  0x1f   :  { %p372_p1 = pnand %p371_p0, %p365_p11 }
  0x21   :  { %375 = shalt.err (!%p372_p1)
}
  0x22   :  { %35 = dma.hbm_to_vmem [thread:$0]  %s488_s1, 512, %s30_s30, [#allocation6], %s405_s25, %s405_s25, %s406_s26  }
  0x23   :  { %398 = dma.done.wait [#allocation3], 256  }
  0x24   :  { %399 = vsyncadd [#allocation3], 4294967040 }
  0x25   :  { %400 = dma.done.wait [#allocation6], 512  }
  0x26   :  { %401 = vsyncadd [#allocation6], 4294966784  ;;  %vm59_vm0 = vcmask 261120   ;;  %v48_v0 = vld [vmem:[#allocation5] sm:$0xff]  ;;  %v49_v1 = vld [vmem:[#allocation5 + $0x8] sm:$0xff]  ;;  %v172_v28 = vlaneseq  ;;  %vm182_vm1 = vcmask 1041409  }
  0x27   :  { %v50_v2 = vld [vmem:[#allocation5 + $0x10] sm:$0xff]  ;;  %v300_v3 = vpack.c.bf16 %v49_v1, %v48_v0  ;;  %v51_v4 = vld [vmem:[#allocation5 + $0x18] sm:$0xff]  ;;  %vm185_vm2 = vcmask 58368   ;;  %v408_v38 = vmov 0  }
  0x28   :  { %v46_v5 = vld [vmem:[#allocation2] sm:$0xff]  ;;  %v304_v6 = vpack.c.bf16 %v51_v4, %v50_v2  ;;  %v47_v7 = vld [vmem:[#allocation2 + $0x8] sm:$0xff]  ;;  %v173_v29 = vand.u32 127, %v172_v28  ;;  %v175_v30 = vshrl.u32 %v172_v28, 7  ;;  %315 = vset.pattern.permute.xlu0 %v408_v38  ;;  %314 = vset.pattern.permute.xlu1 %v408_v38 }
  0x29   :  { %297 = vmatprep.mubr.msk.f32.mxu0 %vm59_vm0, %v46_v5  ;;  %301 = vmatprep.subr.bf16.mxu0 %v300_v3  ;;  %v277_v8 = vld [vmem:[%s489_s2] ss:$0 sm:$0xff]  ;;  %s409_s2 = smov [#allocation7]  }
  0x2a   :  { %303 = vmatpush3.bf16.msra.mxu0 %v300_v3  ;;  %v282_v21 = vld [vmem:[%s490_s3] ss:$0 sm:$0xff]  ;;  %v176_v32 = vsub.s32 %v173_v29, %v175_v30  ;;  %v192_v39 = vsub.s32 0, %v175_v30  ;;  %v196_v40 = vsub.s32 1, %v175_v30  ;;  %s267_s3 = sshll.u32 %s409_s2, 4  ;;  %s268_s3 = int_to_ptr.vmem [resolvable:$true] %s267_s3 }
  0x2b   :  { %305 = vmatprep.subr.bf16.mxu0 %v304_v6  ;;  %s376_s17 = scalar_lea.vmem %s268_s3, 32  ;;  %p381_p3 = scmp.lt.s32.totalorder %s268_s3, %s268_s3 }
  0x2c   :  { %p377_p2 = scmp.ne.s32.totalorder %s268_s3, %s376_s17  ;;  %p382_p4 = scmp.lt.s32.totalorder %s376_s17, %s376_s17 }
  0x2e   :  { %307 = vmatpush3.bf16.msra.mxu0 %v304_v6  ;;  %p383_p5 = por %p382_p4, %p381_p3 }
  0x30   :  { %p384_p6 = pnand %p383_p5, %p377_p2 }
  0x31   :  { %298 = vmatmul.mubr.msk.f32.vlgmr.msra.gmra.mrb[0].mxu0 %vm59_vm0, %v47_v7 }
 0x104   :  { %v299_v9 = vpop.f32.mrb[0].mxu0 }
 0x105   :  { %v138_v10 = vadd.f32 %v299_v9, %v277_v8  ;;  %v132_v11 = vpop.f32.mrb[1].mxu0 }
 0x106   :  { %v133_v12 = vadd.f32 %v277_v8, %v132_v11 }
 0x107   :  { %v281_v13 = vmul.f32 -1.442695, %v138_v10 }
 0x108   :  { %v280_v14 = vmul.f32 -1.442695, %v133_v12 }
 0x109   :  { %316 = vpow2.f32 %v281_v13 }
 0x10a   :  { %318 = vpow2.f32 %v280_v14 }
 0x113   :  { %v317_v15 = vpop.eup %316 }
 0x114   :  { %v319_v16 = vpop.eup %318  ;;  %v148_v17 = vadd.f32 1.0, %v317_v15 }
 0x115   :  { %v147_v18 = vadd.f32 1.0, %v319_v16 }
 0x116   :  { %320 = vrcp.f32 %v148_v17 }
 0x117   :  { %322 = vrcp.f32 %v147_v18 }
 0x120   :  { %v321_v19 = vpop.eup %320 }
 0x121   :  { %v323_v20 = vpop.eup %322  ;;  %v154_v22 = vmul.f32 %v321_v19, %v138_v10 }
 0x122   :  { %v153_v23 = vmul.f32 %v323_v20, %v133_v12 }
 0x123   :  { %v163_v26 = vmul.f32 %v282_v21, %v154_v22 }
 0x124   :  { %v162_v24 = vmul.f32 %v282_v21, %v153_v23 }
 0x125   :  { %v167_v27 = vsel %vm59_vm0, %v163_v26, 0.0 }
 0x126   :  { %v164_v25 = vsel %vm59_vm0, %v162_v24, 0.0 }
 0x127   :  { %165 = vadd.xlane.f32.xlu0 %v164_v25 }
 0x12b   :  { %168 = vadd.xlane.f32.xlu0 %v167_v27 }
 0x1b4   :  { %v166_v31 = vpop.xlane.xlu0 %165 }
 0x1b5   :  { %v177_v34 = vrot.slane %v166_v31, %v176_v32 }
 0x1b8   :  { %v169_v33 = vpop.xlane.xlu0 %168 }
 0x1b9   :  { %v181_v35 = vrot.slane %v169_v33, %v176_v32 }
 0x1bb   :  { %v183_v36 = vsel %vm182_vm1, %v181_v35, %v177_v34 }
 0x1bc   :  { %v186_v37 = vsel %vm185_vm2, %v183_v36, -inf }
 0x1bd   :  { %187 = vmax.xlane.f32.xlu1 %v186_v37 }
 0x24a   :  { %v188_v41 = vpop.xlane.xlu1 %187 }
 0x24b   :  { %v193_v42 = vrot.slane %v188_v41, %v192_v39  ;;  %v197_v43 = vrot.slane %v188_v41, %v196_v40 }
 0x24d   :  { %v200_v44 = vsub.f32 %v166_v31, %v193_v42  ;;  %v201_v45 = vsub.f32 %v169_v33, %v197_v43 }
 0x24f   :  { %v202_v46 = vmul.f32 1.442695, %v200_v44  ;;  %v204_v47 = vmul.f32 1.442695, %v201_v45 }
 0x251   :  { %324 = vpow2.f32 %v202_v46 }
 0x252   :  { %326 = vpow2.f32 %v204_v47 }
 0x25b   :  { %v325_v48 = vpop.eup %324 }
 0x25c   :  { %v327_v49 = vpop.eup %326  ;;  %209 = vperm.xlu1 %314, %v325_v48  }
 0x25d   :  { %212 = vperm.xlu0 %315, %v327_v49  }
 0x2db   :  { %v210_v50 = vpop.permute.xlu1 %209 }
 0x2dc   :  { %v213_v51 = vpop.permute.xlu0 %212  ;;  %v217_v52 = vrot.slane %v210_v50, %v176_v32 }
 0x2dd   :  { %v221_v53 = vrot.slane %v213_v51, %v176_v32 }
 0x2df   :  { %v222_v54 = vsel %vm182_vm1, %v221_v53, %v217_v52 }
 0x2e0   :  { %v224_v55 = vsel %vm185_vm2, %v222_v54, 0.0 }
 0x2e1   :  { %225 = vadd.xlane.f32.xlu1 %v224_v55 }
 0x36e   :  { %v226_v56 = vpop.xlane.xlu1 %225 }
 0x36f   :  { %v231_v57 = vrot.slane %v226_v56, %v192_v39  ;;  %v235_v58 = vrot.slane %v226_v56, %v196_v40 }
 0x371   :  { %328 = vrcp.f32 %v231_v57 }
 0x372   :  { %330 = vrcp.f32 %v235_v58 }
 0x37b   :  { %v329_v59 = vpop.eup %328 }
 0x37c   :  { %v239_v60 = vmul.f32 %v329_v59, %v325_v48  ;;  %v331_v61 = vpop.eup %330 }
 0x37d   :  { %v241_v62 = vmul.f32 %v331_v61, %v327_v49 }
 0x37e   :  { %245 = vperm.xlu0 %315, %v239_v60  }
 0x382   :  { %248 = vperm.xlu0 %315, %v241_v62  }
 0x3fd   :  { %v246_v63 = vpop.permute.xlu0 %245 }
 0x3fe   :  { %v253_v1 = vrot.slane %v246_v63, %v176_v32 }
 0x401   :  { %v249_v0 = vpop.permute.xlu0 %248 }
 0x402   :  { %v257_v2 = vrot.slane %v249_v0, %v176_v32 }
 0x404   :  { %v258_v3 = vsel %vm182_vm1, %v257_v2, %v253_v1 }
 0x405   :  { %260 = vst.msk [vmem:[#allocation7] sm:$0x3] %vm185_vm2, %v258_v3 }
 0x406   :  { %387 = shalt.err (!%p384_p6)
}
 0x407   :  { %s388_s20 = scalar_lea.hbm %s491_s4, 32 }
 0x408   :  { %p389_p7 = scmp.ne.s32.totalorder %s491_s4, %s388_s20  ;;  %p392_p8 = scmp.lt.u32.totalorder %s388_s20, %s491_s4 }
 0x40a   :  { %p394_p9 = pnand %p392_p8, %p389_p7 }
 0x40c   :  { %397 = shalt.err (!%p394_p9)
}
 0x40d   :  { %270 = dma.vmem_to_hbm [thread:$0]  %s268_s3, 32, %s491_s4, [#allocation4]  }
 0x40e   :  { %402 = dma.done.wait [#allocation4], 32  }
 0x40f   :  { %403 = vsyncadd [#allocation4], 4294967264 }
 0x410   :  { %274 = vsyncpa [#allocation3], 1 }
 0x411   :  { %275 = vsyncpa [#allocation6], 1 }
 0x412   :  { %276 = vsyncpa [#allocation4], 1 }

</bundles_post_ra>
